<compile_context>
chip_gen: v5e
topology: v5e:2x2
jax: 0.10.0
libtpu: 0.0.40
codegen_flags: <defaults>
</compile_context>

<pallas_src>
import functools
import math

import jax
import jax.numpy as jnp
from jax import lax
from jax.experimental import pallas as pl
from jax.experimental.pallas import tpu as pltpu

LAYER_NUM = 2
EPS = 0.2  # forward() hard-codes 0.2 * raw (self.eps is unused in forward)


def _round_up(x, m):
    return ((x + m - 1) // m) * m


def _lcm(a, b):
    return a * b // math.gcd(a, b)


def _tpu_defaults():
    """(gate_bf16, vmem_limit_bytes) picked per TPU generation."""
    try:
        kind = jax.devices()[0].device_kind.lower()
    except Exception:  # pragma: no cover - defensive
        kind = ""
    is_v5 = "v5" in kind
    is_v7 = "v7" in kind
    gate_bf16 = not is_v5                      # bf16 EUP/VALU on v6e/v7x
    if is_v7:
        vmem = 48 * 1024 * 1024                # v7x: 64 MiB physical per TC
    elif is_v5 or "v6" in kind:
        vmem = 100 * 1024 * 1024               # v5e/v6e: 128 MiB physical
    else:
        vmem = 48 * 1024 * 1024                # unknown: conservative (safe everywhere)
    return gate_bf16, vmem


# ---------------------------------------------------------------------------
# Kernels
# ---------------------------------------------------------------------------

def _in_proj_kernel(x_ref, w_ref, b_ref, o_ref):
    """raw = relu(h0 @ w1 + b1), one dst row tile per grid step."""
    # TODO(synk): F.dropout / per-edge nn.Dropout are identity in eval mode and are omitted.
    o_ref[...] = jnp.maximum(
        jnp.dot(x_ref[...], w_ref[...], preferred_element_type=jnp.float32) + b_ref[...],
        0.0)


def _gate_prep_kernel(h_ref, d_ref, gw_ref, gb_ref, a_ref, b_ref, hs_ref):
    """Once-per-layer gate terms + degree-scaled features (O(N*HID), VPU/XLU path).

    a[v]  = h[v] . w_dst + gb   (column)
    b[u]  = h[u] . w_src        (row, pre-transposed so the hot loop never transposes)
    hs[u] = d[u] * h[u]  (bf16) (pre-scaled operand for the aggregation MXU matmul)
    """
    h = h_ref[...]
    a_ref[...] = jnp.sum(h * gw_ref[0:1, :], axis=1, keepdims=True) + gb_ref[...]
    b_col = jnp.sum(h * gw_ref[1:2, :], axis=1, keepdims=True)
    b_ref[...] = jnp.transpose(b_col)
    hs_ref[...] = (h * d_ref[...]).astype(jnp.bfloat16)


def _layer_kernel(nz_ref,      # SMEM (I*K,) int32  per-tile nonzero flag (scalar prefetch)
                  fi_ref,      # SMEM (I*K,) int32  remapped wadj dst-block index (index_map only)
                  fk_ref,      # SMEM (I*K,) int32  remapped wadj src-block index (index_map only)
                  a_ref,       # VMEM (TM, 1)   f32  dst gate term (+ bias)
                  b_ref,       # VMEM (1, TN)   f32  src gate term
                  hs_ref,      # VMEM bf16  d[u]*h[u]: (N_pad, HID) resident or (TN, HID) streamed
                  wadj_ref,    # VMEM (TM, TN)  bf16 streamed edge-weight tile (dst, src)
                  raw_ref,     # VMEM (TM, HID) f32  residual input
                  d_ref,       # VMEM (TM, 1)   f32  dst normalizer
                  out_ref,     # VMEM (TM, HID) f32  new node features for this dst tile
                  acc_ref,     # VMEM (TM, HID) f32  scratch accumulator
                  *, tn, gate_bf16, hs_resident):
    i = pl.program_id(0)
    k = pl.program_id(1)
    nk = pl.num_programs(1)

    @pl.when(k == 0)
    def _():
        acc_ref[...] = jnp.zeros_like(acc_ref)

    # Block-sparse skip: tiles with no edges contribute exactly zero (their wadj/hs DMAs
    # were already suppressed by the fetch_i/fetch_k index remapping).
    @pl.when(nz_ref[i * nk + k] != 0)
    def _():
        if gate_bf16:
            # v6e/v7x: bf16 EUP tanh + bf16 VALU multiply directly against bf16 wadj.
            alpha = jnp.tanh(a_ref[...].astype(jnp.bfloat16)
                             + b_ref[...].astype(jnp.bfloat16))          # (TM, TN) bf16
            e = alpha * wadj_ref[...]
        else:
            # v5e: f32 EUP/VALU path (no bf16 VPU/EUP there).
            alpha = jnp.tanh(a_ref[...] + b_ref[...])                    # (TM, TN) f32
            e = (alpha * wadj_ref[...].astype(jnp.float32)).astype(jnp.bfloat16)
        if hs_resident:
            off = pl.multiple_of(k * tn, 128)
            hs = hs_ref[pl.ds(off, tn), :]
        else:
            hs = hs_ref[...]
        # bf16 x bf16 MXU matmul, f32 accumulate.
        acc_ref[...] += jnp.dot(e, hs, preferred_element_type=jnp.float32)

    @pl.when(k == pl.num_programs(1) - 1)
    def _():
        # z[v] = d[v] * sum_u alpha*wadj*(d[u]h[u])  ==  (alpha * d * dT * wadj) @ h
        out_ref[...] = EPS * raw_ref[...] + d_ref[...] * acc_ref[...]


def _out_proj_kernel(h_ref, w_ref, b_ref, o_ref):
    """out = h @ w2 + b2 into a 128-lane-padded slab (unmasked, lane-dense stores)."""
    o_ref[...] = jnp.dot(h_ref[...], w_ref[...], preferred_element_type=jnp.float32) + b_ref[...]


# ---------------------------------------------------------------------------
# Wrapper
# ---------------------------------------------------------------------------

def spectral_sgcn2(h0, params, wadj, d, *, tm=512, tn=2048,
                   gate_bf16=None, vmem_limit_bytes=None):
    """SpectralSGCN2 forward. wadj: (N_dst, N_src) dense edge weights, d: (N, 1)."""
    n, in_dim = h0.shape
    hid = params["w1"].shape[1]
    out_dim = params["w2"].shape[1]
    layer_num = params["gb"].shape[1]

    auto_bf16, auto_vmem = _tpu_defaults()
    if gate_bf16 is None:
        gate_bf16 = auto_bf16
    if vmem_limit_bytes is None:
        vmem_limit_bytes = auto_vmem

    # Tile sizes: multiples of 128 (tm is also a lane dim of the row-vector b),
    # clamped so tiny graphs are not over-padded. Defaults (512, 2048) amortize the
    # ~0.35us per-grid-step overhead; double-buffered wadj is ~4 MiB, well inside
    # even v7x's 64 MiB VMEM together with the (TM,TN) elementwise temporaries.
    cap = _round_up(n, 128)
    tm = _round_up(min(int(tm), cap), 128)
    tn = _round_up(min(int(tn), cap), 128)
    n_pad = _round_up(n, _lcm(tm, tn))
    ni = n_pad // tm        # dst row tiles
    nk = n_pad // tn        # src col tiles
    out_pad = _round_up(out_dim, 128)

    f32 = jnp.float32
    # Zero padding: padded src columns have wadj == 0 -> contribute nothing;
    # padded dst rows are sliced off at the end.
    h0p = jnp.zeros((n_pad, in_dim), f32).at[:n, :].set(h0.astype(f32))
    dp = jnp.zeros((n_pad, 1), f32).at[:n, :].set(d.astype(f32))
    # Pad W_adj directly in the streaming dtype (bf16): halves the only O(N^2) HBM operand
    # and avoids a transient f32 N^2 copy + extra full memory pass.
    # TODO(synk): for exactly-{-1,0,+1} signed weights an int8 stream (VPU convert in-kernel)
    # would halve this again on bandwidth-bound v5e; needs a data-dependent legality check.
    wadjp = jnp.zeros((n_pad, n_pad), jnp.bfloat16).at[:n, :n].set(wadj.astype(jnp.bfloat16))

    # Per-(dst-tile, src-tile) nonzero flags, flattened 1D in grid order (i outer, k inner)
    # so the SMEM array pads tightly.
    nz = (jnp.max(jnp.abs(wadjp).reshape(ni, tm, nk, tn), axis=(1, 3)) > 0)
    nz_flat = nz.reshape(ni * nk).astype(jnp.int32)
    # DMA-skip remap: for empty tiles, fetch the same block as the previous step
    # (identical block index => the pipeline issues no new DMA).
    steps = jnp.arange(ni * nk, dtype=jnp.int32)
    last_nz = lax.cummax(jnp.where(nz_flat != 0, steps, -1), axis=0)
    last_nz = jnp.maximum(last_nz, 0)
    fetch_i = (last_nz // nk).astype(jnp.int32)
    fetch_k = (last_nz % nk).astype(jnp.int32)

    # Keep hs (= d*h, bf16) VMEM-resident when it is small, so it is loaded once per layer
    # instead of being re-streamed for every dst tile.
    hs_resident = (2 * n_pad * hid * 2) <= (8 * 1024 * 1024)

    w2p = jnp.zeros((hid, out_pad), f32).at[:, :out_dim].set(params["w2"].astype(f32))
    b2p = jnp.zeros((1, out_pad), f32).at[:, :out_dim].set(params["b2"].astype(f32))

    row_params = pltpu.CompilerParams(dimension_semantics=("parallel",))

    # --- input projection + relu ---------------------------------------------------------
    raw = pl.pallas_call(
        _in_proj_kernel,
        out_shape=jax.ShapeDtypeStruct((n_pad, hid), f32),
        grid=(ni,),
        in_specs=[pl.BlockSpec((tm, in_dim), lambda i: (i, 0)),
                  pl.BlockSpec((in_dim, hid), lambda i: (0, 0)),
                  pl.BlockSpec((1, hid), lambda i: (0, 0))],
        out_specs=pl.BlockSpec((tm, hid), lambda i: (i, 0)),
        compiler_params=row_params,
    )(h0p, params["w1"].astype(f32), params["b1"].astype(f32))

    layer_fn = functools.partial(_layer_kernel, tn=tn,
                                 gate_bf16=gate_bf16, hs_resident=hs_resident)
    if hs_resident:
        hs_spec = pl.BlockSpec((n_pad, hid), lambda i, k, *_: (0, 0))
    else:
        hs_spec = pl.BlockSpec((tn, hid),
                               lambda i, k, nz_r, fi_r, fk_r: (fk_r[i * nk + k], 0))

    h = raw
    for l in range(layer_num):
        gw_l = jnp.transpose(params["gw"][:, 2 * l:2 * l + 2]).astype(f32)   # (2, HID)
        gb_l = params["gb"][:, l:l + 1].astype(f32)                          # (1, 1)

        # --- once-per-layer gate / scaling prep (O(N*HID)) --------------------------------
        a, b_row, hs = pl.pallas_call(
            _gate_prep_kernel,
            out_shape=(jax.ShapeDtypeStruct((n_pad, 1), f32),
                       jax.ShapeDtypeStruct((1, n_pad), f32),
                       jax.ShapeDtypeStruct((n_pad, hid), jnp.bfloat16)),
            grid=(ni,),
            in_specs=[pl.BlockSpec((tm, hid), lambda i: (i, 0)),
                      pl.BlockSpec((tm, 1), lambda i: (i, 0)),
                      pl.BlockSpec((2, hid), lambda i: (0, 0)),
                      pl.BlockSpec((1, 1), lambda i: (0, 0))],
            out_specs=(pl.BlockSpec((tm, 1), lambda i: (i, 0)),
                       pl.BlockSpec((1, tm), lambda i: (0, i)),
                       pl.BlockSpec((tm, hid), lambda i: (i, 0))),
            compiler_params=row_params,
        )(h, dp, gw_l, gb_l)

        # --- the O(N^2) edge work: grid over (dst tile, src tile) -------------------------
        h = pl.pallas_call(
            layer_fn,
            out_shape=jax.ShapeDtypeStruct((n_pad, hid), f32),
            grid_spec=pltpu.PrefetchScalarGridSpec(
                num_scalar_prefetch=3,
                grid=(ni, nk),
                in_specs=[
                    pl.BlockSpec((tm, 1), lambda i, k, *_: (i, 0)),       # a (dst)
                    pl.BlockSpec((1, tn), lambda i, k, *_: (0, k)),       # b (src)
                    hs_spec,                                              # d*h (bf16)
                    pl.BlockSpec((tm, tn),                                # wadj tile (streamed,
                                 lambda i, k, nz_r, fi_r, fk_r:           #  DMA-skipped when empty)
                                 (fi_r[i * nk + k], fk_r[i * nk + k])),
                    pl.BlockSpec((tm, hid), lambda i, k, *_: (i, 0)),     # raw (dst)
                    pl.BlockSpec((tm, 1), lambda i, k, *_: (i, 0)),       # d (dst)
                ],
                out_specs=pl.BlockSpec((tm, hid), lambda i, k, *_: (i, 0)),
                scratch_shapes=[pltpu.VMEM((tm, hid), jnp.float32)],
            ),
            compiler_params=pltpu.CompilerParams(
                dimension_semantics=("parallel", "arbitrary"),
                vmem_limit_bytes=vmem_limit_bytes),
        )(nz_flat, fetch_i, fetch_k, a, b_row, hs, wadjp, raw, dp)

    # --- output projection into a lane-dense (128-wide) slab, sliced in the wrapper -------
    outp = pl.pallas_call(
        _out_proj_kernel,
        out_shape=jax.ShapeDtypeStruct((n_pad, out_pad), f32),
        grid=(ni,),
        in_specs=[pl.BlockSpec((tm, hid), lambda i: (i, 0)),
                  pl.BlockSpec((hid, out_pad), lambda i: (0, 0)),
                  pl.BlockSpec((1, out_pad), lambda i: (0, 0))],
        out_specs=pl.BlockSpec((tm, out_pad), lambda i: (i, 0)),
        compiler_params=row_params,
    )(h, w2p, b2p)

    return outp[:n, :out_dim]


def reference(h0, params, wadj, d):
    """Pure-JAX f32 reference of the same dense-graph math."""
    h = jnp.maximum(h0 @ params["w1"] + params["b1"], 0.0)
    raw = h
    layer_num = params["gb"].shape[1]
    for l in range(layer_num):
        ab = h @ params["gw"][:, 2 * l:2 * l + 2]
        alpha = jnp.tanh(ab[:, 0:1] + ab[:, 1:2].T + params["gb"][0, l])
        e = alpha * d * d.T * wadj
        h = EPS * raw + e @ h
    return h @ params["w2"] + params["b2"]


if __name__ == "__main__":
    N, IN, HID, OUT = 320, 16, 32, 8
    key = jax.random.PRNGKey(0)
    k = jax.random.split(key, 10)

    # node features
    h0 = jax.random.normal(k[0], (N, IN), jnp.float32)

    # synthetic signed graph (dense): edge mask, +/-1 weights, degree-based 'd'
    mask = (jax.random.uniform(k[1], (N, N)) < 0.05).astype(jnp.float32)
    mask = mask * (1.0 - jnp.eye(N, dtype=jnp.float32))
    # carve out an empty block of (dst, src) tiles to exercise the block-sparse/DMA-skip path
    mask = mask.at[:128, 128:].set(0.0)
    sign = jnp.where(jax.random.uniform(k[2], (N, N)) < 0.5, -1.0, 1.0)
    wadj = (mask * sign).astype(jnp.float32)                 # (dst, src)
    deg = jnp.sum(mask, axis=1) + jnp.sum(mask, axis=0) + 1.0
    d = (1.0 / jnp.sqrt(deg)).reshape(N, 1).astype(jnp.float32)

    # deterministic parameter init (xavier_normal with gain=1.414 for weights)
    def xavier(kk, shape, fan_in, fan_out, gain=1.414):
        std = gain * (2.0 / (fan_in + fan_out)) ** 0.5
        return (std * jax.random.normal(kk, shape)).astype(jnp.float32)

    w1 = xavier(k[3], (IN, HID), IN, HID)                    # t1.weight^T
    b1 = ((jax.random.uniform(k[4], (1, HID)) - 0.5) * 2.0 / jnp.sqrt(IN)).astype(jnp.float32)
    w2 = xavier(k[5], (HID, OUT), HID, OUT)                  # t2.weight^T
    b2 = ((jax.random.uniform(k[6], (1, OUT)) - 0.5) * 2.0 / jnp.sqrt(HID)).astype(jnp.float32)
    # per-layer gate Linear(2*HID, 1): dst half -> column 2l, src half -> column 2l+1
    gw = xavier(k[7], (HID, 2 * LAYER_NUM), 2 * HID, 1)
    gb = ((jax.random.uniform(k[8], (1, LAYER_NUM)) - 0.5) * 2.0 / jnp.sqrt(2 * HID)).astype(jnp.float32)

    params = dict(w1=w1, b1=b1, w2=w2, b2=b2, gw=gw, gb=gb)

    ref = reference(h0, params, wadj, d)

    # Small tiles: exercises a 3x3 grid, padding, block-sparse DMA-skip, f32 gate path.
    out_small = spectral_sgcn2(h0, params, wadj, d, tm=128, tn=128, gate_bf16=False)
    out_small = jax.block_until_ready(out_small)
    assert out_small.shape == (N, OUT)
    err_small = float(jnp.max(jnp.abs(out_small - ref)))
    assert jnp.allclose(out_small, ref, atol=5e-2, rtol=5e-2), f"max abs err {err_small}"

    # Default tiles (clamped to the graph size): single-tile grid, bf16 gate path.
    out_def = spectral_sgcn2(h0, params, wadj, d, gate_bf16=True)
    out_def = jax.block_until_ready(out_def)
    assert out_def.shape == (N, OUT)
    err_def = float(jnp.max(jnp.abs(out_def - ref)))
    assert jnp.allclose(out_def, ref, atol=5e-2, rtol=5e-2), f"max abs err {err_def}"

    print("KERNEL_OK")
</pallas_src>

<mosaic_0001>
module attributes {stable_mosaic.version = 11 : i64} {
  func.func @_in_proj_kernel(%arg0: i32, %arg1: memref<128x16xf32, #tpu.memory_space<vmem>>, %arg2: memref<16x32xf32, #tpu.memory_space<vmem>>, %arg3: memref<1x32xf32, #tpu.memory_space<vmem>>, %arg4: memref<128x32xf32, #tpu.memory_space<vmem>>) attributes {dimension_semantics = [#tpu.dimension_semantics<parallel>], iteration_bounds = array<i64: 3>, scalar_prefetch = 0 : i64, scratch_operands = 0 : i64, tpu.core_type = #tpu.core_type<tc>, window_params = [{transform_indices = @transform_0, window_bounds = array<i64: 128, 16>}, {pipeline_mode = #tpu.pipeline_mode<synchronous>, transform_indices = @transform_1, window_bounds = array<i64: 16, 32>}, {pipeline_mode = #tpu.pipeline_mode<synchronous>, transform_indices = @transform_2, window_bounds = array<i64: 1, 32>}, {transform_indices = @transform_3, window_bounds = array<i64: 128, 32>}]} {
    %c0 = arith.constant 0 : index
    %c0_0 = arith.constant 0 : index
    %0 = vector.load %arg1[%c0, %c0_0] : memref<128x16xf32, #tpu.memory_space<vmem>>, vector<128x16xf32>
    %c0_1 = arith.constant 0 : index
    %c0_2 = arith.constant 0 : index
    %1 = vector.load %arg2[%c0_1, %c0_2] : memref<16x32xf32, #tpu.memory_space<vmem>>, vector<16x32xf32>
    %cst = arith.constant dense<0.000000e+00> : vector<128x32xf32>
    %2 = tpu.matmul %0, %1, %cst {dimension_numbers = #tpu.dot_dimension_numbers<[1], [0], [0], [1], [0, 0, 1, 1], [], []>} : vector<128x16xf32>, vector<16x32xf32>, vector<128x32xf32> -> vector<128x32xf32>
    %c0_3 = arith.constant 0 : index
    %c0_4 = arith.constant 0 : index
    %3 = vector.load %arg3[%c0_3, %c0_4] : memref<1x32xf32, #tpu.memory_space<vmem>>, vector<1x32xf32>
    %4 = vector.broadcast %3 : vector<1x32xf32> to vector<128x32xf32>
    %5 = arith.addf %2, %4 : vector<128x32xf32>
    %cst_5 = arith.constant 0.000000e+00 : f32
    %6 = vector.broadcast %cst_5 : f32 to vector<128x32xf32>
    %7 = arith.maximumf %5, %6 : vector<128x32xf32>
    %c0_6 = arith.constant 0 : index
    %c0_7 = arith.constant 0 : index
    %8 = vector.load %arg4[%c0_6, %c0_7] : memref<128x32xf32, #tpu.memory_space<vmem>>, vector<128x32xf32>
    tpu.vector_store %arg4[%c0_6, %c0_7], %7 {strides = array<i32>} : memref<128x32xf32, #tpu.memory_space<vmem>>, vector<128x32xf32>,
    return
  }
  func.func @transform_0(%arg0: i32) -> (i32, i32) {
    %c0_i32 = arith.constant 0 : i32
    %c0_i32_0 = arith.constant 0 : i32
    return %arg0, %c0_i32 : i32, i32
  }
  func.func @transform_1(%arg0: i32) -> (i32, i32) {
    %c0_i32 = arith.constant 0 : i32
    %c0_i32_0 = arith.constant 0 : i32
    %c0_i32_1 = arith.constant 0 : i32
    return %c0_i32, %c0_i32_0 : i32, i32
  }
  func.func @transform_2(%arg0: i32) -> (i32, i32) {
    %c0_i32 = arith.constant 0 : i32
    %c0_i32_0 = arith.constant 0 : i32
    %c0_i32_1 = arith.constant 0 : i32
    return %c0_i32, %c0_i32_0 : i32, i32
  }
  func.func @transform_3(%arg0: i32) -> (i32, i32) {
    %c0_i32 = arith.constant 0 : i32
    %c0_i32_0 = arith.constant 0 : i32
    return %arg0, %c0_i32 : i32, i32
  }
}

</mosaic_0001>

<bundles_post_ra>
// kernel: tpu_custom_call.1
= control target key start
LH: loop header
LB: loop body
LE: loop exit
PB: predicated region body
PF: predicated region fallthrough
CT: control target
= control target key end

     0   :  { %s469_s12 = smov 0   ;;  %s552_s0 = inlined_call_operand.vmem [shape: f32[384,16], index: 0, kind: input, shape index: {}]   ;;  %s553_s1 = inlined_call_operand.vmem [shape: f32[16,32], index: 1, kind: input, shape index: {}]   ;;  %s554_s2 = inlined_call_operand.vmem [shape: f32[1,32], index: 2, kind: input, shape index: {}]   ;;  %s555_s3 = inlined_call_operand.vmem [shape: f32[384,32], index: 3, kind: output, shape index: {}]  }
   0x1 LB: > { %s399_s13 = sadd.s32 4294967295, %s447_s12   ;;  %p403_p0 = scmp.ge.s32.totalorder %s447_s12, 1  ;;  %s447_s12 = sphi %s469_s12, %s13_s12  }
   0x2   : > { %p138_p1 = scmp.lt.s32.totalorder %s447_s12, 4 }
   0x4   : > { %p139_p2 = pnand %p403_p0, %p138_p1 }
   0x5   : > { %s404_s18 = sshll.u32 (!%p139_p2), %s399_s13, 4 }
   0x6   : > { %142 = sbr.rel (%p139_p2) target bundleno = 178 (0xb2), region = 32  ;;  %p163_p3 = scmp.lt.s32.totalorder (!%p139_p2), %s404_s18, 47 }
   0xb   : > { %v191_v0 = vld [vmem:[%s553_s1 + $0x8] sm:$0xff]  ;;  %v190_v1 = vld [vmem:[%s553_s1] sm:$0xff]  ;;  %s557_s18 = smov (!%p163_p3, %s404_s18), 47  ;;  %vm196_vm0 = vcmask 130048   ;;  %vm326_vm1 = vcmask 261120  }
   0xc   : > { %427 = vmatpush.msra.mxu2 %v191_v0  ;;  %428 = vmatpush.msra.mxu3 %v191_v0  ;;  %s405_s19 = sshll.u32 %s557_s18, 3  ;;  %v440_v18 = vld [vmem:[%s554_s2] ss:$0 sm:$0xff] }
   0xd   : > { %259 = vmatpush.msra.mxu0 %v191_v0  ;;  %426 = vmatpush.msra.mxu1 %v191_v0  ;;  %s166_s22 = scalar_lea.vmem %s552_s0, %s405_s19  ;;  %s515_s27 = scalar_lea.vmem %s555_s3, %s405_s19 }
   0xe   : > { %430 = vmatpush.msra.mxu2 %v190_v1  ;;  %431 = vmatpush.msra.mxu3 %v190_v1  ;;  %v182_v2 = vld [vmem:[%s166_s22 + $0x40] sm:$0xff]  ;;  %v183_v6 = vld [vmem:[%s166_s22 + $0x48] sm:$0xff]  ;;  %v184_v10 = vld [vmem:[%s166_s22 + $0x50] sm:$0xff] }
   0xf   : > { %260 = vmatpush.msra.mxu0 %v190_v1  ;;  %429 = vmatpush.msra.mxu1 %v190_v1  ;;  %v186_v3 = vld [vmem:[%s166_s22 + $0x60] sm:$0xff]  ;;  %v187_v7 = vld [vmem:[%s166_s22 + $0x68] sm:$0xff]  ;;  %v188_v11 = vld [vmem:[%s166_s22 + $0x70] sm:$0xff] }
  0x10   : > { %v174_v4 = vld [vmem:[%s166_s22] sm:$0xff]  ;;  %416 = vmatmul.msk.f32.vlgmr.msra.gmra.mxu2 %vm196_vm0, %v182_v2  ;;  %420 = vmatmul.msk.f32.vlgmr.msra.gmra.mxu3 %vm196_vm0, %v186_v3  ;;  %v175_v8 = vld [vmem:[%s166_s22 + $0x8] sm:$0xff]  ;;  %v176_v12 = vld [vmem:[%s166_s22 + $0x10] sm:$0xff] }
  0x11   : > { %v178_v5 = vld [vmem:[%s166_s22 + $0x20] sm:$0xff]  ;;  %408 = vmatmul.msk.f32.vlgmr.msra.gmra.mxu0 %vm196_vm0, %v174_v4  ;;  %v179_v9 = vld [vmem:[%s166_s22 + $0x28] sm:$0xff]  ;;  %v180_v13 = vld [vmem:[%s166_s22 + $0x30] sm:$0xff] }
  0x12   : > { %412 = vmatmul.msk.f32.vlgmr.msra.gmra.mxu1 %vm196_vm0, %v178_v5  ;;  %v185_v14 = vld [vmem:[%s166_s22 + $0x58] sm:$0xff] }
  0x13   : > { %v189_v15 = vld [vmem:[%s166_s22 + $0x78] sm:$0xff] }
  0x14   : > { %v177_v16 = vld [vmem:[%s166_s22 + $0x18] sm:$0xff] }
  0x15   : > { %v181_v17 = vld [vmem:[%s166_s22 + $0x38] sm:$0xff] }
  0x18   : > { %417 = vmatmul.msk.f32.gmra.mxu2 %vm196_vm0, %v183_v6  ;;  %421 = vmatmul.msk.f32.gmra.mxu3 %vm196_vm0, %v187_v7 }
  0x19   : > { %409 = vmatmul.msk.f32.gmra.mxu0 %vm196_vm0, %v175_v8 }
  0x1a   : > { %413 = vmatmul.msk.f32.gmra.mxu1 %vm196_vm0, %v179_v9 }
  0x20   : > { %418 = vmatmul.msk.f32.gmra.mxu2 %vm196_vm0, %v184_v10  ;;  %422 = vmatmul.msk.f32.gmra.mxu3 %vm196_vm0, %v188_v11 }
  0x21   : > { %410 = vmatmul.msk.f32.gmra.mxu0 %vm196_vm0, %v176_v12 }
  0x22   : > { %414 = vmatmul.msk.f32.gmra.mxu1 %vm196_vm0, %v180_v13 }
  0x28   : > { %419 = vmatmul.msk.f32.gmra.mxu2 %vm196_vm0, %v185_v14  ;;  %423 = vmatmul.msk.f32.gmra.mxu3 %vm196_vm0, %v189_v15 }
  0x29   : > { %411 = vmatmul.msk.f32.gmra.mxu0 %vm196_vm0, %v177_v16 }
  0x2a   : > { %415 = vmatmul.msk.f32.gmra.mxu1 %vm196_vm0, %v181_v17 }
  0x8e   : > { %v262_v19 = vpop.f32.mrf.mxu0 }
  0x8f   : > { %v274_v20 = vpop.f32.mrf.mxu1  ;;  %v263_v21 = vadd.f32 %v440_v18, %v262_v19 }
  0x90   : > { %v275_v22 = vadd.f32 %v440_v18, %v274_v20 }
  0x91   : > { %v310_v23 = vmax.f32 %v263_v21, 0.0 }
  0x92   : > { %v314_v24 = vmax.f32 %v275_v22, 0.0 }
  0x93   : > { %327 = vst.msk [vmem:[%s515_s27] sm:$0xff] %vm326_vm1, %v310_v23  ;;  %v286_v25 = vpop.f32.mrf.mxu2  ;;  %v298_v26 = vpop.f32.mrf.mxu3 }
  0x94   : > { %331 = vst.msk [vmem:[%s515_s27 + $0x20] sm:$0xff] %vm326_vm1, %v314_v24  ;;  %v287_v27 = vadd.f32 %v440_v18, %v286_v25  ;;  %v299_v28 = vadd.f32 %v440_v18, %v298_v26 }
  0x96   : > { %v318_v29 = vmax.f32 %v287_v27, 0.0  ;;  %v322_v30 = vmax.f32 %v299_v28, 0.0  ;;  %v265_v31 = vpop.f32.mrf.mxu0 }
  0x97   : > { %v277_v32 = vpop.f32.mrf.mxu1  ;;  %v266_v33 = vadd.f32 %v440_v18, %v265_v31 }
  0x98   : > { %v278_v34 = vadd.f32 %v440_v18, %v277_v32  ;;  %335 = vst.msk [vmem:[%s515_s27 + $0x40] sm:$0xff] %vm326_vm1, %v318_v29 }
  0x99   : > { %339 = vst.msk [vmem:[%s515_s27 + $0x60] sm:$0xff] %vm326_vm1, %v322_v30  ;;  %v311_v35 = vmax.f32 %v266_v33, 0.0 }
  0x9a   : > { %v315_v36 = vmax.f32 %v278_v34, 0.0 }
  0x9b   : > { %328 = vst.msk [vmem:[%s515_s27 + $0x8] sm:$0xff] %vm326_vm1, %v311_v35  ;;  %v289_v37 = vpop.f32.mrf.mxu2  ;;  %v301_v38 = vpop.f32.mrf.mxu3 }
  0x9c   : > { %332 = vst.msk [vmem:[%s515_s27 + $0x28] sm:$0xff] %vm326_vm1, %v315_v36  ;;  %v290_v39 = vadd.f32 %v440_v18, %v289_v37  ;;  %v302_v40 = vadd.f32 %v440_v18, %v301_v38 }
  0x9e   : > { %v319_v41 = vmax.f32 %v290_v39, 0.0  ;;  %v323_v42 = vmax.f32 %v302_v40, 0.0  ;;  %v268_v43 = vpop.f32.mrf.mxu0 }
  0x9f   : > { %v280_v44 = vpop.f32.mrf.mxu1  ;;  %v269_v45 = vadd.f32 %v440_v18, %v268_v43 }
  0xa0   : > { %v281_v46 = vadd.f32 %v440_v18, %v280_v44  ;;  %336 = vst.msk [vmem:[%s515_s27 + $0x48] sm:$0xff] %vm326_vm1, %v319_v41 }
  0xa1   : > { %340 = vst.msk [vmem:[%s515_s27 + $0x68] sm:$0xff] %vm326_vm1, %v323_v42  ;;  %v312_v47 = vmax.f32 %v269_v45, 0.0 }
  0xa2   : > { %v316_v48 = vmax.f32 %v281_v46, 0.0 }
  0xa3   : > { %329 = vst.msk [vmem:[%s515_s27 + $0x10] sm:$0xff] %vm326_vm1, %v312_v47  ;;  %v292_v49 = vpop.f32.mrf.mxu2  ;;  %v304_v50 = vpop.f32.mrf.mxu3 }
  0xa4   : > { %333 = vst.msk [vmem:[%s515_s27 + $0x30] sm:$0xff] %vm326_vm1, %v316_v48  ;;  %v293_v51 = vadd.f32 %v440_v18, %v292_v49  ;;  %v305_v52 = vadd.f32 %v440_v18, %v304_v50 }
  0xa6   : > { %v320_v53 = vmax.f32 %v293_v51, 0.0  ;;  %v324_v54 = vmax.f32 %v305_v52, 0.0  ;;  %v271_v55 = vpop.f32.mrf.mxu0 }
  0xa7   : > { %v283_v56 = vpop.f32.mrf.mxu1  ;;  %v272_v57 = vadd.f32 %v440_v18, %v271_v55 }
  0xa8   : > { %v284_v58 = vadd.f32 %v440_v18, %v283_v56  ;;  %337 = vst.msk [vmem:[%s515_s27 + $0x50] sm:$0xff] %vm326_vm1, %v320_v53 }
  0xa9   : > { %341 = vst.msk [vmem:[%s515_s27 + $0x70] sm:$0xff] %vm326_vm1, %v324_v54  ;;  %v313_v59 = vmax.f32 %v272_v57, 0.0 }
  0xaa   : > { %v317_v60 = vmax.f32 %v284_v58, 0.0 }
  0xab   : > { %330 = vst.msk [vmem:[%s515_s27 + $0x18] sm:$0xff] %vm326_vm1, %v313_v59  ;;  %v295_v61 = vpop.f32.mrf.mxu2  ;;  %v307_v62 = vpop.f32.mrf.mxu3 }
  0xac   : > { %334 = vst.msk [vmem:[%s515_s27 + $0x38] sm:$0xff] %vm326_vm1, %v317_v60  ;;  %v296_v63 = vadd.f32 %v440_v18, %v295_v61  ;;  %v308_v0 = vadd.f32 %v440_v18, %v307_v62 }
  0xae   : > { %v321_v1 = vmax.f32 %v296_v63, 0.0  ;;  %v325_v2 = vmax.f32 %v308_v0, 0.0 }
  0xb0   : > { %338 = vst.msk [vmem:[%s515_s27 + $0x58] sm:$0xff] %vm326_vm1, %v321_v1 }
  0xb1   : > { %342 = vst.msk [vmem:[%s515_s27 + $0x78] sm:$0xff] %vm326_vm1, %v325_v2 }
  0xb2 PF: > { %s13_s12 = sadd.s32 1, %s447_s12  }
  0xb3   : > { %p10_p4 = scmp.ge.s32.totalorder %s13_s12, 5  }
  0xb5   :  { %12 = sbr.rel (!%p10_p4) target bundleno = 1 (0x1), region = 62 }

</bundles_post_ra>
